<compile_context>
chip_gen: v7x
topology: tpu7x:2x2x1
jax: 0.10.0
libtpu: 0.0.40
codegen_flags: <defaults>
</compile_context>

<pallas_src>
import functools

import jax
import jax.numpy as jnp
from jax.experimental import pallas as pl
from jax.experimental.pallas import tpu as pltpu


def decoder_kernel(x_ref, w_ref, b_ref, o_ref):
    # x_ref: (TB, HO), w_ref: (HO, LO) resident, b_ref: (1, LO) resident,
    # o_ref: (TB, LO)
    logits = jnp.dot(x_ref[...], w_ref[...],
                     preferred_element_type=jnp.float32)   # MXU, f32 accumulate
    logits = logits + b_ref[...]                           # (1, LO) -> (TB, LO)
    # Sigmoid runs on the EUP in f32; cast only at the store.
    o_ref[...] = jax.nn.sigmoid(logits).astype(o_ref.dtype)


@functools.partial(jax.jit, static_argnames=("block_b", "use_bf16_matmul"))
def decoder_forward(x, w, b, *, block_b=512, use_bf16_matmul=False):
    """sigmoid(x @ w + b) via a batch-tiled Pallas kernel.

    x: [B, HO]   w: [HO, LO] (transpose of the PyTorch nn.Linear weight)
    b: [LO]
    """
    B, HO = x.shape
    HO2, LO = w.shape
    assert HO == HO2
    out_dtype = x.dtype

    # Optional bf16 MXU inputs for large shapes on v6e/v7x; accumulation stays f32.
    if use_bf16_matmul:
        x = x.astype(jnp.bfloat16)
        w = w.astype(jnp.bfloat16)

    b2 = b.reshape(1, LO).astype(jnp.float32)

    # Batch tile: whole batch when small (full-extent block is always legal),
    # otherwise a big multiple of 8 so per-step overhead amortizes.
    tb = B if B <= block_b else block_b

    # Pad batch to a multiple of tb so every grid step is a full block.
    pad = (-B) % tb
    if pad:
        x = jnp.pad(x, ((0, pad), (0, 0)))
    bp = B + pad
    grid = (bp // tb,)

    out = pl.pallas_call(
        decoder_kernel,
        out_shape=jax.ShapeDtypeStruct((bp, LO), out_dtype),
        grid_spec=pltpu.PrefetchScalarGridSpec(
            num_scalar_prefetch=0,
            grid=grid,
            in_specs=[
                # x: one batch tile per grid step (double-buffered by Pallas).
                pl.BlockSpec((tb, HO), lambda i: (i, 0)),
                # weight: same block every step -> stays resident in VMEM.
                pl.BlockSpec((HO, LO), lambda i: (0, 0)),
                # bias: resident (1, LO) block, broadcast-added in the kernel.
                pl.BlockSpec((1, LO), lambda i: (0, 0)),
            ],
            out_specs=pl.BlockSpec((tb, LO), lambda i: (i, 0)),
        ),
        compiler_params=pltpu.CompilerParams(
            # Batch tiles are independent -> megacore sharding on v7x,
            # harmless on single-TC v5e/v6e.
            dimension_semantics=("parallel",),
        ),
    )(x, w, b2)

    if pad:
        out = out[:B]
    return out


def reference_forward(x, w, b):
    return jax.nn.sigmoid(x @ w + b[None, :])


if __name__ == "__main__":
    key = jax.random.PRNGKey(0)
    kx, kw, kb, kx2 = jax.random.split(key, 4)

    # Small shapes implied by the module: Decoder(stu_ho_dim=32, stu_lo_dim=16)
    B, STU_HO_DIM, STU_LO_DIM = 8, 32, 16

    # Deterministic parameter init (mimicking nn.Linear uniform init bounds).
    bound = 1.0 / (STU_HO_DIM ** 0.5)
    w = jax.random.uniform(kw, (STU_HO_DIM, STU_LO_DIM), dtype=jnp.float32,
                           minval=-bound, maxval=bound)
    b = jax.random.uniform(kb, (STU_LO_DIM,), dtype=jnp.float32,
                           minval=-bound, maxval=bound)

    # --- Small batch (single full-extent block, grid=(1,)) -------------------
    x = jax.random.normal(kx, (B, STU_HO_DIM), dtype=jnp.float32)
    out = jax.block_until_ready(decoder_forward(x, w, b))
    ref = reference_forward(x, w, b)
    assert out.shape == (B, STU_LO_DIM)
    assert jnp.allclose(out, ref, atol=1e-5, rtol=1e-5)

    # --- Larger batch exercising the batch grid + pad/slice path -------------
    B2 = 1152  # not a multiple of the 512 batch tile -> exercises padding
    x2 = jax.random.normal(kx2, (B2, STU_HO_DIM), dtype=jnp.float32)
    out2 = jax.block_until_ready(decoder_forward(x2, w, b))
    ref2 = reference_forward(x2, w, b)
    assert out2.shape == (B2, STU_LO_DIM)
    assert jnp.allclose(out2, ref2, atol=1e-5, rtol=1e-5)

    print("KERNEL_OK")
</pallas_src>

<mosaic_0001>
module attributes {stable_mosaic.version = 11 : i64} {
  func.func @decoder_kernel(%arg0: i32, %arg1: memref<8x32xf32, #tpu.memory_space<vmem>>, %arg2: memref<32x16xf32, #tpu.memory_space<vmem>>, %arg3: memref<1x16xf32, #tpu.memory_space<vmem>>, %arg4: memref<8x16xf32, #tpu.memory_space<vmem>>) attributes {dimension_semantics = [#tpu.dimension_semantics<parallel>], iteration_bounds = array<i64: 1>, scalar_prefetch = 0 : i64, scratch_operands = 0 : i64, tpu.core_type = #tpu.core_type<tc>, window_params = [{transform_indices = @transform_0, window_bounds = array<i64: 8, 32>}, {pipeline_mode = #tpu.pipeline_mode<synchronous>, transform_indices = @transform_1, window_bounds = array<i64: 32, 16>}, {pipeline_mode = #tpu.pipeline_mode<synchronous>, transform_indices = @transform_2, window_bounds = array<i64: 1, 16>}, {transform_indices = @transform_3, window_bounds = array<i64: 8, 16>}]} {
    %c0 = arith.constant 0 : index
    %c0_0 = arith.constant 0 : index
    %0 = vector.load %arg1[%c0, %c0_0] : memref<8x32xf32, #tpu.memory_space<vmem>>, vector<8x32xf32>
    %c0_1 = arith.constant 0 : index
    %c0_2 = arith.constant 0 : index
    %1 = vector.load %arg2[%c0_1, %c0_2] : memref<32x16xf32, #tpu.memory_space<vmem>>, vector<32x16xf32>
    %cst = arith.constant dense<0.000000e+00> : vector<8x16xf32>
    %2 = tpu.matmul %0, %1, %cst {dimension_numbers = #tpu.dot_dimension_numbers<[1], [0], [0], [1], [0, 0, 1, 1], [], []>} : vector<8x32xf32>, vector<32x16xf32>, vector<8x16xf32> -> vector<8x16xf32>
    %c0_3 = arith.constant 0 : index
    %c0_4 = arith.constant 0 : index
    %3 = vector.load %arg3[%c0_3, %c0_4] : memref<1x16xf32, #tpu.memory_space<vmem>>, vector<1x16xf32>
    %4 = vector.broadcast %3 : vector<1x16xf32> to vector<8x16xf32>
    %5 = arith.addf %2, %4 : vector<8x16xf32>
    %6 = arith.negf %5 : vector<8x16xf32>
    %7 = math.exp %6 : vector<8x16xf32>
    %cst_5 = arith.constant 1.000000e+00 : f32
    %8 = vector.broadcast %cst_5 : f32 to vector<8x16xf32>
    %9 = arith.addf %8, %7 : vector<8x16xf32>
    %10 = arith.divf %8, %9 : vector<8x16xf32>
    %c0_6 = arith.constant 0 : index
    %c0_7 = arith.constant 0 : index
    %11 = vector.load %arg4[%c0_6, %c0_7] : memref<8x16xf32, #tpu.memory_space<vmem>>, vector<8x16xf32>
    tpu.vector_store %arg4[%c0_6, %c0_7], %10 {strides = array<i32>} : memref<8x16xf32, #tpu.memory_space<vmem>>, vector<8x16xf32>,
    return
  }
  func.func @transform_0(%arg0: i32) -> (i32, i32) {
    %c0_i32 = arith.constant 0 : i32
    %c0_i32_0 = arith.constant 0 : i32
    return %arg0, %c0_i32 : i32, i32
  }
  func.func @transform_1(%arg0: i32) -> (i32, i32) {
    %c0_i32 = arith.constant 0 : i32
    %c0_i32_0 = arith.constant 0 : i32
    %c0_i32_1 = arith.constant 0 : i32
    return %c0_i32, %c0_i32_0 : i32, i32
  }
  func.func @transform_2(%arg0: i32) -> (i32, i32) {
    %c0_i32 = arith.constant 0 : i32
    %c0_i32_0 = arith.constant 0 : i32
    %c0_i32_1 = arith.constant 0 : i32
    return %c0_i32, %c0_i32_0 : i32, i32
  }
  func.func @transform_3(%arg0: i32) -> (i32, i32) {
    %c0_i32 = arith.constant 0 : i32
    %c0_i32_0 = arith.constant 0 : i32
    return %arg0, %c0_i32 : i32, i32
  }
}

</mosaic_0001>

<bundles_post_ra>
// kernel: decoder_forward.1
= control target key start
LH: loop header
LB: loop body
LE: loop exit
PB: predicated region body
PF: predicated region fallthrough
CT: control target
= control target key end

     0   :  { %v180_v3 = vmov 0.0|0.0   ;;  %vm181_vm0 = vmmov 0   ;;  %v182_v6 = vmov 0.0   ;;  %s234_s0 = inlined_call_operand.vmem [shape: f32[8,32], index: 0, kind: input, shape index: {}]   ;;  %s235_s1 = inlined_call_operand.vmem [shape: f32[32,16], index: 1, kind: input, shape index: {}]   ;;  %s236_s2 = inlined_call_operand.vmem [shape: f32[1,16], index: 2, kind: input, shape index: {}]   ;;  %s237_s3 = inlined_call_operand.hbm [shape: f32[8,16], index: 3, kind: output, shape index: {}]  }
   0x1   :  { %v16_v0 = vld [vmem:[%s235_s1] sm:$0xff]  ;;  %v17_v1 = vld [vmem:[%s235_s1 + $0x8] sm:$0xff]  ;;  %v18_v2 = vld [vmem:[%s235_s1 + $0x10] sm:$0xff]  ;;  %142 = vmatprep.subr.bf16.mxu0 %v180_v3  ;;  %139 = vmatprep.mubr.msk.f32.mxu0 %vm181_vm0, %v182_v6 }
   0x2   :  { %v143_v4 = vpack.c.bf16 %v17_v1, %v16_v0  ;;  %v19_v5 = vld [vmem:[%s235_s1 + $0x18] sm:$0xff] }
   0x3   :  { %8 = vsyncpa [#allocation3], 0  ;;  %v146_v7 = vpack.c.bf16 %v19_v5, %v18_v2  ;;  %v15_v8 = vld [vmem:[%s234_s0] sm:$0xff]  ;;  %vm27_vm1 = vcmask 261120   ;;  %s183_s1 = smov [#allocation2]   ;;  %vm107_vm2 = vcmask 130048  }
   0x4   :  { %144 = vmatpush3.bf16.msra.mxu0 %v143_v4  ;;  %v123_v9 = vld [vmem:[%s236_s2] ss:$0 sm:$0xff]  ;;  %s115_s24 = sshll.u32 %s183_s1, 4  ;;  %s116_s24 = int_to_ptr.vmem [resolvable:$true] %s115_s24 }
   0x5   :  { %145 = vmatprep.subr.bf16.mxu0 %v180_v3  ;;  %s156_s0 = scalar_lea.vmem %s116_s24, 128  ;;  %p161_p1 = scmp.lt.s32.totalorder %s116_s24, %s116_s24 }
   0x6   :  { %p157_p0 = scmp.ne.s32.totalorder %s116_s24, %s156_s0  ;;  %p162_p2 = scmp.lt.s32.totalorder %s156_s0, %s156_s0 }
   0x8   :  { %147 = vmatpush3.bf16.msra.mxu0 %v146_v7  ;;  %p163_p3 = por %p162_p2, %p161_p1 }
   0xa   :  { %p164_p4 = pnand %p163_p3, %p157_p0 }
   0xb   :  { %140 = vmatmul.mubr.msk.f32.vlgmr.msra.gmra.mrb[0].mxu0 %vm27_vm1, %v15_v8 }
  0xde   :  { %v97_v10 = vpop.f32.mrb[0].mxu0 }
  0xdf   :  { %v98_v11 = vadd.f32 %v123_v9, %v97_v10  ;;  %v141_v12 = vpop.f32.mrb[1].mxu0 }
  0xe1   :  { %v125_v13 = vmul.f32 -1.442695, %v98_v11 }
  0xe3   :  { %152 = vpow2.f32 %v125_v13 }
  0xed   :  { %v153_v14 = vpop.eup %152 }
  0xee   :  { %v104_v15 = vadd.f32 1.0, %v153_v14 }
  0xf0   :  { %154 = vrcp.f32 %v104_v15 }
  0xfa   :  { %v155_v16 = vpop.eup %154 }
  0xfb   :  { %108 = vst.msk [vmem:[#allocation2] sm:$0xff] %vm107_vm2, %v155_v16 }
  0xfc   :  { %167 = shalt.err (!%p164_p4)
}
  0xfd   :  { %s168_s26 = scalar_lea.hbm %s237_s3, 128 }
  0xfe   :  { %p169_p5 = scmp.ne.s32.totalorder %s237_s3, %s168_s26  ;;  %p172_p6 = scmp.lt.u32.totalorder %s168_s26, %s237_s3 }
 0x100   :  { %p174_p7 = pnand %p172_p6, %p169_p5 }
 0x102   :  { %177 = shalt.err (!%p174_p7)
}
 0x103   :  { %118 = dma.vmem_to_hbm [thread:$0]  %s116_s24, 128, %s237_s3, [#allocation3]  }
 0x104   :  { %178 = dma.done.wait [#allocation3], 128  }
 0x105   :  { %179 = vsyncadd [#allocation3], 4294967168 }
 0x106   :  { %122 = vsyncpa [#allocation3], 1 }

</bundles_post_ra>
